<compile_context>
chip_gen: v7x
topology: tpu7x:2x2x1
jax: 0.10.0
libtpu: 0.0.40
codegen_flags: <defaults>
</compile_context>

<pallas_src>
import jax
import jax.numpy as jnp
from jax.experimental import pallas as pl
from jax.experimental.pallas import tpu as pltpu


def _conv3_thresh_or_kernel(w_ref, prev_ref, cur_ref, next_ref, out_ref, xs_ref):
    """3x3 conv (1->2ch, zero pad=1), >0, OR over channels, on one row tile.

    w_ref:    (18,)  f32 SMEM  conv3 weights, layout [o, kh, kw] flattened
    prev_ref: (8,  W) f32 VMEM 8-row block containing the row above the tile
    cur_ref:  (tH, W) f32 VMEM current row tile (batch 0 / channel 0)
    next_ref: (8,  W) f32 VMEM 8-row block containing the row below the tile
    out_ref:  (tH, W) i8  VMEM 0/1 result
    xs_ref:   (tH+2, W) f32 VMEM scratch: row-haloed tile
    """
    tH, W = out_ref.shape
    i = pl.program_id(0)
    n = pl.num_programs(0)

    # ---- assemble the row-haloed tile in VMEM scratch --------------------
    # Top halo row: last row of the block above, or zeros at the image top.
    xs_ref[pl.ds(0, 1), :] = prev_ref[pl.ds(7, 1), :]

    @pl.when(i == 0)
    def _():
        xs_ref[pl.ds(0, 1), :] = jnp.zeros((1, W), jnp.float32)

    # Body rows.
    xs_ref[pl.ds(1, tH), :] = cur_ref[...]

    # Bottom halo row: first row of the block below, or zeros at the image bottom.
    xs_ref[pl.ds(tH + 1, 1), :] = next_ref[pl.ds(0, 1), :]

    @pl.when(i == n - 1)
    def _():
        xs_ref[pl.ds(tH + 1, 1), :] = jnp.zeros((1, W), jnp.float32)

    # ---- 3 sublane-offset loads: rows[dh][r, c] == x[r + dh - 1, c] ------
    rows = [xs_ref[pl.ds(dh, tH), :] for dh in range(3)]

    # Lane-border masks for the zero padding along W.
    lane = jax.lax.broadcasted_iota(jnp.int32, (tH, W), 1)
    not_first_col = lane > 0          # left neighbour of col 0 is zero pad
    not_last_col = lane < (W - 1)     # right neighbour of col W-1 is zero pad

    acc0 = jnp.zeros((tH, W), jnp.float32)
    acc1 = jnp.zeros((tH, W), jnp.float32)
    for dh in range(3):
        ctr = rows[dh]
        # lft[:, c] = x[:, c-1] (zero at c==0);  rgt[:, c] = x[:, c+1] (zero at c==W-1)
        lft = jnp.where(not_first_col, pltpu.roll(ctr, 1, 1), 0.0)
        rgt = jnp.where(not_last_col, pltpu.roll(ctr, W - 1, 1), 0.0)
        b = 3 * dh
        acc0 = acc0 + w_ref[b] * lft + w_ref[b + 1] * ctr + w_ref[b + 2] * rgt
        acc1 = acc1 + w_ref[9 + b] * lft + w_ref[9 + b + 1] * ctr + w_ref[9 + b + 2] * rgt

    # (conv > 0) per channel, then logical OR over the 2 channels; store as int8 0/1.
    out_ref[...] = jnp.logical_or(acc0 > 0.0, acc1 > 0.0).astype(jnp.int8)


def net_forward(x, conv3_weight, *, max_tile_h=256):
    """x: (N, 1, H, W) f32 NCHW.  conv3_weight: (2, 1, 3, 3) f32.  Returns (H, W) bool."""
    N, C, H, W = x.shape
    assert C == 1, "Net.conv3 expects a single input channel"
    assert H % 8 == 0, "demo kernel assumes H is a multiple of 8"

    # Largest row tile that divides H, is a multiple of 8 and <= max_tile_h.
    # max_tile_h keeps double-buffered tiles comfortably inside VMEM (incl. v7x 64 MiB).
    if H <= max_tile_h:
        tile_h = H
    else:
        tile_h = 8
        for t in range(max_tile_h - max_tile_h % 8, 7, -8):
            if H % t == 0:
                tile_h = t
                break
    n_tiles = H // tile_h
    nsub = tile_h // 8      # 8-row sub-blocks per tile (halo index maps)
    h8 = H // 8             # total 8-row sub-blocks in the image

    w_flat = conv3_weight.astype(jnp.float32).reshape(-1)   # (18,) = [o, kh, kw]

    out_i8 = pl.pallas_call(
        _conv3_thresh_or_kernel,
        grid=(n_tiles,),
        in_specs=[
            # Weights: whole (18,) array resident in SMEM (loaded once, never re-tiled).
            pl.BlockSpec(memory_space=pltpu.MemorySpace.SMEM),
            # 8-row block holding the halo row ABOVE the tile (clamped at the top edge).
            pl.BlockSpec((None, None, 8, W),
                         lambda i: (0, 0, jnp.maximum(i * nsub - 1, 0), 0)),
            # The row tile itself; batch 0 / channel 0 selected via squeezed dims.
            pl.BlockSpec((None, None, tile_h, W), lambda i: (0, 0, i, 0)),
            # 8-row block holding the halo row BELOW the tile (clamped at the bottom edge).
            pl.BlockSpec((None, None, 8, W),
                         lambda i: (0, 0, jnp.minimum((i + 1) * nsub, h8 - 1), 0)),
        ],
        out_specs=pl.BlockSpec((tile_h, W), lambda i: (i, 0)),
        out_shape=jax.ShapeDtypeStruct((H, W), jnp.int8),
        scratch_shapes=[pltpu.VMEM((tile_h + 2, W), jnp.float32)],
        compiler_params=pltpu.CompilerParams(
            dimension_semantics=("parallel",),   # shard row tiles across TCs on v7x
            vmem_limit_bytes=48 * 1024 * 1024,
        ),
    )(w_flat, x, x, x)

    # Tiny cast to match torch's bool output dtype (kernel already wrote 1-byte 0/1).
    return out_i8.astype(jnp.bool_)


def _check_against_reference(x, out, conv3_weight, tol=1e-4):
    """Exact check against lax.conv everywhere the >0 decision is FP-unambiguous."""
    ref_conv = jax.lax.conv_general_dilated(
        x, conv3_weight, window_strides=(1, 1), padding=((1, 1), (1, 1)),
        dimension_numbers=("NCHW", "OIHW", "NCHW"),
        precision=jax.lax.Precision.HIGHEST)
    a, b = ref_conv[0, 0], ref_conv[0, 1]
    ref = jnp.logical_or(a > 0, b > 0)
    # Elements whose conv outputs sit within `tol` of the threshold can legitimately
    # flip under different f32 accumulation orders; require exact agreement elsewhere.
    decided = jnp.logical_or(jnp.logical_or(a > tol, b > tol),
                             jnp.logical_and(a < -tol, b < -tol))
    assert out.shape == ref.shape and out.dtype == jnp.bool_
    assert bool(jnp.all(jnp.logical_or(out == ref, ~decided)))


if __name__ == "__main__":
    key = jax.random.PRNGKey(0)
    k_x, k_w3, k_w5, k_x2 = jax.random.split(key, 4)

    # Small shapes consistent with the module: NCHW input with 1 channel.
    N, C, H, W = 2, 1, 16, 16
    x = jax.random.normal(k_x, (N, C, H, W), dtype=jnp.float32)

    # Deterministic parameter init (shapes from the nn.Conv2d definitions).
    conv3_weight = jax.random.normal(k_w3, (2, 1, 3, 3), dtype=jnp.float32) * 0.3
    conv5_weight = jax.random.normal(k_w5, (2, 1, 5, 5), dtype=jnp.float32) * 0.2  # unused in forward

    out = jax.block_until_ready(net_forward(x, conv3_weight))
    _check_against_reference(x, out, conv3_weight)

    # Also exercise the multi-tile (gridded, halo-exchange) path.
    x2 = jax.random.normal(k_x2, (1, 1, 64, 128), dtype=jnp.float32)
    out2 = jax.block_until_ready(net_forward(x2, conv3_weight, max_tile_h=32))
    _check_against_reference(x2, out2, conv3_weight)

    print("KERNEL_OK")
</pallas_src>

<mosaic_0001>
module attributes {stable_mosaic.version = 11 : i64} {
  func.func @_conv3_thresh_or_kernel(%arg0: i32, %arg1: memref<18xf32, #tpu.memory_space<smem>>, %arg2: memref<1x1x8x16xf32, #tpu.memory_space<vmem>>, %arg3: memref<1x1x16x16xf32, #tpu.memory_space<vmem>>, %arg4: memref<1x1x8x16xf32, #tpu.memory_space<vmem>>, %arg5: memref<16x16xi8, #tpu.memory_space<vmem>>, %arg6: memref<18x16xf32, #tpu.memory_space<vmem>>) attributes {dimension_semantics = [#tpu.dimension_semantics<parallel>], iteration_bounds = array<i64: 1>, scalar_prefetch = 0 : i64, scratch_operands = 1 : i64, tpu.core_type = #tpu.core_type<tc>, window_params = [{transform_indices = @transform_0, window_bounds = array<i64: 18>}, {transform_indices = @transform_1, window_bounds = array<i64: 1, 1, 8, 16>}, {transform_indices = @transform_2, window_bounds = array<i64: 1, 1, 16, 16>}, {transform_indices = @transform_3, window_bounds = array<i64: 1, 1, 8, 16>}, {transform_indices = @transform_4, window_bounds = array<i64: 16, 16>}]} {
    %c0 = arith.constant 0 : index
    %c0_0 = arith.constant 0 : index
    %c7 = arith.constant 7 : index
    %c0_1 = arith.constant 0 : index
    %0 = vector.load %arg2[%c0, %c0_0, %c7, %c0_1] : memref<1x1x8x16xf32, #tpu.memory_space<vmem>>, vector<1x1x1x16xf32>
    %1 = vector.shape_cast %0 : vector<1x1x1x16xf32> to vector<1x16xf32>
    %c0_2 = arith.constant 0 : index
    %c0_3 = arith.constant 0 : index
    %2 = vector.load %arg6[%c0_2, %c0_3] : memref<18x16xf32, #tpu.memory_space<vmem>>, vector<1x16xf32>
    tpu.vector_store %arg6[%c0_2, %c0_3], %1 {strides = array<i32>} : memref<18x16xf32, #tpu.memory_space<vmem>>, vector<1x16xf32>,
    %c0_i32 = arith.constant 0 : i32
    %3 = arith.cmpi eq, %arg0, %c0_i32 : i32
    %4 = arith.extui %3 : i1 to i32
    %c0_i32_4 = arith.constant 0 : i32
    %5 = arith.cmpi ne, %4, %c0_i32_4 : i32
    scf.if %5 {
      %cst_44 = arith.constant 0.000000e+00 : f32
      %122 = vector.broadcast %cst_44 : f32 to vector<1x16xf32>
      %c0_45 = arith.constant 0 : index
      %c0_46 = arith.constant 0 : index
      %123 = vector.load %arg6[%c0_45, %c0_46] : memref<18x16xf32, #tpu.memory_space<vmem>>, vector<1x16xf32>
      tpu.vector_store %arg6[%c0_45, %c0_46], %122 {strides = array<i32>} : memref<18x16xf32, #tpu.memory_space<vmem>>, vector<1x16xf32>,
    } else {
    }
    %c0_5 = arith.constant 0 : index
    %c0_6 = arith.constant 0 : index
    %c0_7 = arith.constant 0 : index
    %c0_8 = arith.constant 0 : index
    %6 = vector.load %arg3[%c0_5, %c0_6, %c0_7, %c0_8] : memref<1x1x16x16xf32, #tpu.memory_space<vmem>>, vector<1x1x16x16xf32>
    %7 = vector.shape_cast %6 : vector<1x1x16x16xf32> to vector<16x16xf32>
    %c1 = arith.constant 1 : index
    %c0_9 = arith.constant 0 : index
    %8 = vector.load %arg6[%c1, %c0_9] : memref<18x16xf32, #tpu.memory_space<vmem>>, vector<16x16xf32>
    tpu.vector_store %arg6[%c1, %c0_9], %7 {strides = array<i32>} : memref<18x16xf32, #tpu.memory_space<vmem>>, vector<16x16xf32>,
    %c0_10 = arith.constant 0 : index
    %c0_11 = arith.constant 0 : index
    %c0_12 = arith.constant 0 : index
    %c0_13 = arith.constant 0 : index
    %9 = vector.load %arg4[%c0_10, %c0_11, %c0_12, %c0_13] : memref<1x1x8x16xf32, #tpu.memory_space<vmem>>, vector<1x1x1x16xf32>
    %10 = vector.shape_cast %9 : vector<1x1x1x16xf32> to vector<1x16xf32>
    %c17 = arith.constant 17 : index
    %c0_14 = arith.constant 0 : index
    %11 = vector.load %arg6[%c17, %c0_14] : memref<18x16xf32, #tpu.memory_space<vmem>>, vector<1x16xf32>
    tpu.vector_store %arg6[%c17, %c0_14], %10 {strides = array<i32>} : memref<18x16xf32, #tpu.memory_space<vmem>>, vector<1x16xf32>,
    %c0_i32_15 = arith.constant 0 : i32
    %12 = arith.cmpi eq, %arg0, %c0_i32_15 : i32
    %13 = arith.extui %12 : i1 to i32
    %c0_i32_16 = arith.constant 0 : i32
    %14 = arith.cmpi ne, %13, %c0_i32_16 : i32
    scf.if %14 {
      %cst_44 = arith.constant 0.000000e+00 : f32
      %122 = vector.broadcast %cst_44 : f32 to vector<1x16xf32>
      %c17_45 = arith.constant 17 : index
      %c0_46 = arith.constant 0 : index
      %123 = vector.load %arg6[%c17_45, %c0_46] : memref<18x16xf32, #tpu.memory_space<vmem>>, vector<1x16xf32>
      tpu.vector_store %arg6[%c17_45, %c0_46], %122 {strides = array<i32>} : memref<18x16xf32, #tpu.memory_space<vmem>>, vector<1x16xf32>,
    } else {
    }
    %c0_17 = arith.constant 0 : index
    %c0_18 = arith.constant 0 : index
    %15 = vector.load %arg6[%c0_17, %c0_18] : memref<18x16xf32, #tpu.memory_space<vmem>>, vector<16x16xf32>
    %c1_19 = arith.constant 1 : index
    %c0_20 = arith.constant 0 : index
    %16 = vector.load %arg6[%c1_19, %c0_20] : memref<18x16xf32, #tpu.memory_space<vmem>>, vector<16x16xf32>
    %c2 = arith.constant 2 : index
    %c0_21 = arith.constant 0 : index
    %17 = vector.load %arg6[%c2, %c0_21] : memref<18x16xf32, #tpu.memory_space<vmem>>, vector<16x16xf32>
    %18 = tpu.iota {dimensions = array<i32: 1>} : vector<16x16xi32>
    %c0_i32_22 = arith.constant 0 : i32
    %19 = vector.broadcast %c0_i32_22 : i32 to vector<16x16xi32>
    %20 = arith.cmpi sgt, %18, %19 : vector<16x16xi32>
    %c15_i32 = arith.constant 15 : i32
    %21 = vector.broadcast %c15_i32 : i32 to vector<16x16xi32>
    %22 = arith.cmpi slt, %18, %21 : vector<16x16xi32>
    %cst = arith.constant 0.000000e+00 : f32
    %23 = vector.broadcast %cst : f32 to vector<16x16xf32>
    %cst_23 = arith.constant 0.000000e+00 : f32
    %24 = vector.broadcast %cst_23 : f32 to vector<16x16xf32>
    %c1_i32 = arith.constant 1 : i32
    %25 = tpu.dynamic_rotate %15 by %c1_i32 dim 1 : vector<16x16xf32>, i32 -> vector<16x16xf32>
    %cst_24 = arith.constant 0.000000e+00 : f32
    %26 = vector.broadcast %cst_24 : f32 to vector<16x16xf32>
    %27 = arith.select %20, %25, %26 : vector<16x16xi1>, vector<16x16xf32>
    %c15_i32_25 = arith.constant 15 : i32
    %28 = tpu.dynamic_rotate %15 by %c15_i32_25 dim 1 : vector<16x16xf32>, i32 -> vector<16x16xf32>
    %cst_26 = arith.constant 0.000000e+00 : f32
    %29 = vector.broadcast %cst_26 : f32 to vector<16x16xf32>
    %30 = arith.select %22, %28, %29 : vector<16x16xi1>, vector<16x16xf32>
    %c0_27 = arith.constant 0 : index
    %31 = memref.load %arg1[%c0_27] : memref<18xf32, #tpu.memory_space<smem>>
    %32 = vector.broadcast %31 : f32 to vector<16x16xf32>
    %33 = arith.mulf %32, %27 : vector<16x16xf32>
    %34 = arith.addf %23, %33 : vector<16x16xf32>
    %c1_28 = arith.constant 1 : index
    %35 = memref.load %arg1[%c1_28] : memref<18xf32, #tpu.memory_space<smem>>
    %36 = vector.broadcast %35 : f32 to vector<16x16xf32>
    %37 = arith.mulf %36, %15 : vector<16x16xf32>
    %38 = arith.addf %34, %37 : vector<16x16xf32>
    %c2_29 = arith.constant 2 : index
    %39 = memref.load %arg1[%c2_29] : memref<18xf32, #tpu.memory_space<smem>>
    %40 = vector.broadcast %39 : f32 to vector<16x16xf32>
    %41 = arith.mulf %40, %30 : vector<16x16xf32>
    %42 = arith.addf %38, %41 : vector<16x16xf32>
    %c9 = arith.constant 9 : index
    %43 = memref.load %arg1[%c9] : memref<18xf32, #tpu.memory_space<smem>>
    %44 = vector.broadcast %43 : f32 to vector<16x16xf32>
    %45 = arith.mulf %44, %27 : vector<16x16xf32>
    %46 = arith.addf %24, %45 : vector<16x16xf32>
    %c10 = arith.constant 10 : index
    %47 = memref.load %arg1[%c10] : memref<18xf32, #tpu.memory_space<smem>>
    %48 = vector.broadcast %47 : f32 to vector<16x16xf32>
    %49 = arith.mulf %48, %15 : vector<16x16xf32>
    %50 = arith.addf %46, %49 : vector<16x16xf32>
    %c11 = arith.constant 11 : index
    %51 = memref.load %arg1[%c11] : memref<18xf32, #tpu.memory_space<smem>>
    %52 = vector.broadcast %51 : f32 to vector<16x16xf32>
    %53 = arith.mulf %52, %30 : vector<16x16xf32>
    %54 = arith.addf %50, %53 : vector<16x16xf32>
    %c1_i32_30 = arith.constant 1 : i32
    %55 = tpu.dynamic_rotate %16 by %c1_i32_30 dim 1 : vector<16x16xf32>, i32 -> vector<16x16xf32>
    %cst_31 = arith.constant 0.000000e+00 : f32
    %56 = vector.broadcast %cst_31 : f32 to vector<16x16xf32>
    %57 = arith.select %20, %55, %56 : vector<16x16xi1>, vector<16x16xf32>
    %c15_i32_32 = arith.constant 15 : i32
    %58 = tpu.dynamic_rotate %16 by %c15_i32_32 dim 1 : vector<16x16xf32>, i32 -> vector<16x16xf32>
    %cst_33 = arith.constant 0.000000e+00 : f32
    %59 = vector.broadcast %cst_33 : f32 to vector<16x16xf32>
    %60 = arith.select %22, %58, %59 : vector<16x16xi1>, vector<16x16xf32>
    %c3 = arith.constant 3 : index
    %61 = memref.load %arg1[%c3] : memref<18xf32, #tpu.memory_space<smem>>
    %62 = vector.broadcast %61 : f32 to vector<16x16xf32>
    %63 = arith.mulf %62, %57 : vector<16x16xf32>
    %64 = arith.addf %42, %63 : vector<16x16xf32>
    %c4 = arith.constant 4 : index
    %65 = memref.load %arg1[%c4] : memref<18xf32, #tpu.memory_space<smem>>
    %66 = vector.broadcast %65 : f32 to vector<16x16xf32>
    %67 = arith.mulf %66, %16 : vector<16x16xf32>
    %68 = arith.addf %64, %67 : vector<16x16xf32>
    %c5 = arith.constant 5 : index
    %69 = memref.load %arg1[%c5] : memref<18xf32, #tpu.memory_space<smem>>
    %70 = vector.broadcast %69 : f32 to vector<16x16xf32>
    %71 = arith.mulf %70, %60 : vector<16x16xf32>
    %72 = arith.addf %68, %71 : vector<16x16xf32>
    %c12 = arith.constant 12 : index
    %73 = memref.load %arg1[%c12] : memref<18xf32, #tpu.memory_space<smem>>
    %74 = vector.broadcast %73 : f32 to vector<16x16xf32>
    %75 = arith.mulf %74, %57 : vector<16x16xf32>
    %76 = arith.addf %54, %75 : vector<16x16xf32>
    %c13 = arith.constant 13 : index
    %77 = memref.load %arg1[%c13] : memref<18xf32, #tpu.memory_space<smem>>
    %78 = vector.broadcast %77 : f32 to vector<16x16xf32>
    %79 = arith.mulf %78, %16 : vector<16x16xf32>
    %80 = arith.addf %76, %79 : vector<16x16xf32>
    %c14 = arith.constant 14 : index
    %81 = memref.load %arg1[%c14] : memref<18xf32, #tpu.memory_space<smem>>
    %82 = vector.broadcast %81 : f32 to vector<16x16xf32>
    %83 = arith.mulf %82, %60 : vector<16x16xf32>
    %84 = arith.addf %80, %83 : vector<16x16xf32>
    %c1_i32_34 = arith.constant 1 : i32
    %85 = tpu.dynamic_rotate %17 by %c1_i32_34 dim 1 : vector<16x16xf32>, i32 -> vector<16x16xf32>
    %cst_35 = arith.constant 0.000000e+00 : f32
    %86 = vector.broadcast %cst_35 : f32 to vector<16x16xf32>
    %87 = arith.select %20, %85, %86 : vector<16x16xi1>, vector<16x16xf32>
    %c15_i32_36 = arith.constant 15 : i32
    %88 = tpu.dynamic_rotate %17 by %c15_i32_36 dim 1 : vector<16x16xf32>, i32 -> vector<16x16xf32>
    %cst_37 = arith.constant 0.000000e+00 : f32
    %89 = vector.broadcast %cst_37 : f32 to vector<16x16xf32>
    %90 = arith.select %22, %88, %89 : vector<16x16xi1>, vector<16x16xf32>
    %c6 = arith.constant 6 : index
    %91 = memref.load %arg1[%c6] : memref<18xf32, #tpu.memory_space<smem>>
    %92 = vector.broadcast %91 : f32 to vector<16x16xf32>
    %93 = arith.mulf %92, %87 : vector<16x16xf32>
    %94 = arith.addf %72, %93 : vector<16x16xf32>
    %c7_38 = arith.constant 7 : index
    %95 = memref.load %arg1[%c7_38] : memref<18xf32, #tpu.memory_space<smem>>
    %96 = vector.broadcast %95 : f32 to vector<16x16xf32>
    %97 = arith.mulf %96, %17 : vector<16x16xf32>
    %98 = arith.addf %94, %97 : vector<16x16xf32>
    %c8 = arith.constant 8 : index
    %99 = memref.load %arg1[%c8] : memref<18xf32, #tpu.memory_space<smem>>
    %100 = vector.broadcast %99 : f32 to vector<16x16xf32>
    %101 = arith.mulf %100, %90 : vector<16x16xf32>
    %102 = arith.addf %98, %101 : vector<16x16xf32>
    %c15 = arith.constant 15 : index
    %103 = memref.load %arg1[%c15] : memref<18xf32, #tpu.memory_space<smem>>
    %104 = vector.broadcast %103 : f32 to vector<16x16xf32>
    %105 = arith.mulf %104, %87 : vector<16x16xf32>
    %106 = arith.addf %84, %105 : vector<16x16xf32>
    %c16 = arith.constant 16 : index
    %107 = memref.load %arg1[%c16] : memref<18xf32, #tpu.memory_space<smem>>
    %108 = vector.broadcast %107 : f32 to vector<16x16xf32>
    %109 = arith.mulf %108, %17 : vector<16x16xf32>
    %110 = arith.addf %106, %109 : vector<16x16xf32>
    %c17_39 = arith.constant 17 : index
    %111 = memref.load %arg1[%c17_39] : memref<18xf32, #tpu.memory_space<smem>>
    %112 = vector.broadcast %111 : f32 to vector<16x16xf32>
    %113 = arith.mulf %112, %90 : vector<16x16xf32>
    %114 = arith.addf %110, %113 : vector<16x16xf32>
    %cst_40 = arith.constant 0.000000e+00 : f32
    %115 = vector.broadcast %cst_40 : f32 to vector<16x16xf32>
    %116 = arith.cmpf ogt, %102, %115 : vector<16x16xf32>
    %cst_41 = arith.constant 0.000000e+00 : f32
    %117 = vector.broadcast %cst_41 : f32 to vector<16x16xf32>
    %118 = arith.cmpf ogt, %114, %117 : vector<16x16xf32>
    %119 = arith.ori %116, %118 : vector<16x16xi1>
    %120 = arith.extui %119 : vector<16x16xi1> to vector<16x16xi8>
    %c0_42 = arith.constant 0 : index
    %c0_43 = arith.constant 0 : index
    %121 = vector.load %arg5[%c0_42, %c0_43] : memref<16x16xi8, #tpu.memory_space<vmem>>, vector<16x16xi8>
    tpu.vector_store %arg5[%c0_42, %c0_43], %120 {strides = array<i32>} : memref<16x16xi8, #tpu.memory_space<vmem>>, vector<16x16xi8>,
    return
  }
  func.func @transform_0(%arg0: i32) -> i32 {
    %c0_i32 = arith.constant 0 : i32
    %c0_i32_0 = arith.constant 0 : i32
    return %c0_i32 : i32
  }
  func.func @transform_1(%arg0: i32) -> (i32, i32, i32, i32) {
    %c2_i32 = arith.constant 2 : i32
    %0 = arith.muli %arg0, %c2_i32 : i32
    %c1_i32 = arith.constant 1 : i32
    %1 = arith.subi %0, %c1_i32 : i32
    %c0_i32 = arith.constant 0 : i32
    %2 = arith.maxsi %1, %c0_i32 : i32
    %c0_i32_0 = arith.constant 0 : i32
    %c0_i32_1 = arith.constant 0 : i32
    %c0_i32_2 = arith.constant 0 : i32
    %c0_i32_3 = arith.constant 0 : i32
    return %c0_i32_0, %c0_i32_1, %2, %c0_i32_2 : i32, i32, i32, i32
  }
  func.func @transform_2(%arg0: i32) -> (i32, i32, i32, i32) {
    %c0_i32 = arith.constant 0 : i32
    %c0_i32_0 = arith.constant 0 : i32
    %c0_i32_1 = arith.constant 0 : i32
    %c0_i32_2 = arith.constant 0 : i32
    return %c0_i32, %c0_i32_0, %arg0, %c0_i32_1 : i32, i32, i32, i32
  }
  func.func @transform_3(%arg0: i32) -> (i32, i32, i32, i32) {
    %c1_i32 = arith.constant 1 : i32
    %0 = arith.addi %arg0, %c1_i32 : i32
    %c2_i32 = arith.constant 2 : i32
    %1 = arith.muli %0, %c2_i32 : i32
    %c1_i32_0 = arith.constant 1 : i32
    %2 = arith.minsi %1, %c1_i32_0 : i32
    %c0_i32 = arith.constant 0 : i32
    %c0_i32_1 = arith.constant 0 : i32
    %c0_i32_2 = arith.constant 0 : i32
    %c0_i32_3 = arith.constant 0 : i32
    return %c0_i32, %c0_i32_1, %2, %c0_i32_2 : i32, i32, i32, i32
  }
  func.func @transform_4(%arg0: i32) -> (i32, i32) {
    %c0_i32 = arith.constant 0 : i32
    %c0_i32_0 = arith.constant 0 : i32
    return %arg0, %c0_i32 : i32, i32
  }
}

</mosaic_0001>

<bundles_post_ra>
// kernel: tpu_custom_call.1
= control target key start
LH: loop header
LB: loop body
LE: loop exit
PB: predicated region body
PF: predicated region fallthrough
CT: control target
= control target key end

     0   :  { %9 = vsyncpa [#allocation6], 0  ;;  %s744_s0 = inlined_call_operand.hbm [shape: f32[18], index: 0, kind: input, shape index: {}]   ;;  %s745_s1 = inlined_call_operand.hbm [shape: f32[2,1,16,16], index: 1, kind: input, shape index: {}]   ;;  %s746_s2 = inlined_call_operand.hbm [shape: f32[2,1,16,16], index: 2, kind: input, shape index: {}]   ;;  %s747_s3 = inlined_call_operand.hbm [shape: f32[2,1,16,16], index: 3, kind: input, shape index: {}]   ;;  %s748_s4 = inlined_call_operand.hbm [shape: s8[16,16], index: 4, kind: output, shape index: {}]  }
   0x1   :  { %10 = vsyncpa [#allocation4], 0 }
   0x2   :  { %11 = vsyncpa [#allocation9], 0 }
   0x3   :  { %12 = vsyncpa [#allocation5], 0  ;;  %s497_s15 = smov [#allocation8]   ;;  %s388_s19 = scalar_lea.hbm %s746_s2, 256 }
   0x4   :  { %s42_s16 = sshll.u32 %s497_s15, 4  ;;  %p389_p0 = scmp.ne.s32.totalorder %s746_s2, %s388_s19  ;;  %s43_s16 = int_to_ptr.vmem [resolvable:$true] %s42_s16 }
   0x5   :  { %s390_s24 = scalar_lea.hbm %s746_s2, 512  ;;  %p392_p2 = scmp.lt.u32.totalorder %s388_s19, %s746_s2 }
   0x6   :  { %p391_p1 = scmp.lt.u32.totalorder %s390_s24, %s388_s19 }
   0x8   :  { %p393_p3 = por %p392_p2, %p391_p1 }
   0xa   :  { %p394_p4 = pnand %p393_p3, %p389_p0 }
   0xc   :  { %397 = shalt.err (!%p394_p4)
}
   0xd   :  { %s398_s27 = scalar_lea.vmem %s43_s16, 256  ;;  %p403_p6 = scmp.lt.s32.totalorder %s43_s16, %s43_s16 }
   0xe   :  { %p399_p5 = scmp.ne.s32.totalorder %s43_s16, %s398_s27  ;;  %p404_p7 = scmp.lt.s32.totalorder %s398_s27, %s398_s27 }
  0x10   :  { %p405_p8 = por %p404_p7, %p403_p6 }
  0x12   :  { %p406_p9 = pnand %p405_p8, %p399_p5 }
  0x14   :  { %409 = shalt.err (!%p406_p9)
}
  0x15   :  { %s498_s28 = smov 128   ;;  %s499_s29 = smov 8  }
  0x16   :  { %48 = dma.hbm_to_vmem [thread:$0]  %s746_s2, 256, %s43_s16, [#allocation9], %s498_s28, %s498_s28, %s499_s29  }
  0x17   :  { %s410_s8 = scalar_lea.hbm %s744_s0, 16 }
  0x18   :  { %p411_p10 = scmp.ne.s32.totalorder %s744_s0, %s410_s8  ;;  %p414_p11 = scmp.lt.u32.totalorder %s410_s8, %s744_s0 }
  0x1a   :  { %p416_p12 = pnand %p414_p11, %p411_p10 }
  0x1c   :  { %419 = shalt.err (!%p416_p12)
}
  0x1d   :  { %s500_s13 = smov [#allocation3]   ;;  %s566_s17 = scalar_lea.hbm %s747_s3, 128 }
  0x1e   :  { %20 = dma.hbm_to_smem %s744_s0, 16, %s500_s13, [#allocation6]  }
  0x1f   :  { %s501_s18 = smov [#allocation7]   ;;  %s502_s20 = smov [#allocation10]  }
  0x20   :  { %s33_s19 = sshll.u32 %s501_s18, 4  ;;  %s61_s21 = sshll.u32 %s502_s20, 4  ;;  %s34_s19 = int_to_ptr.vmem [resolvable:$true] %s33_s19  ;;  %s62_s21 = int_to_ptr.vmem [resolvable:$true] %s61_s21 }
  0x21   :  { %s420_s24 = scalar_lea.hbm %s745_s1, 128  ;;  %s422_s28 = scalar_lea.hbm %s745_s1, 512 }
  0x22   :  { %p421_p13 = scmp.ne.s32.totalorder %s745_s1, %s420_s24  ;;  %p423_p0 = scmp.lt.u32.totalorder %s422_s28, %s420_s24 }
  0x23   :  { %p424_p1 = scmp.lt.u32.totalorder %s420_s24, %s745_s1 }
  0x25   :  { %p425_p2 = por %p424_p1, %p423_p0 }
  0x27   :  { %p426_p3 = pnand %p425_p2, %p421_p13 }
  0x29   :  { %429 = shalt.err (!%p426_p3)
}
  0x2a   :  { %s430_s5 = scalar_lea.vmem %s34_s19, 128  ;;  %p435_p5 = scmp.lt.s32.totalorder %s34_s19, %s34_s19 }
  0x2b   :  { %p431_p4 = scmp.ne.s32.totalorder %s34_s19, %s430_s5  ;;  %p436_p6 = scmp.lt.s32.totalorder %s430_s5, %s430_s5 }
  0x2d   :  { %p437_p7 = por %p436_p6, %p435_p5 }
  0x2f   :  { %p438_p8 = pnand %p437_p7, %p431_p4 }
  0x31   :  { %441 = shalt.err (!%p438_p8)
}
  0x32   :  { %36 = dma.hbm_to_vmem [thread:$0]  %s745_s1, 128, %s34_s19, [#allocation4]  }
  0x33   :  { %s466_s10 = scalar_lea.hbm %s747_s3, 256  ;;  %s444_s13 = scalar_lea.hbm %s747_s3, 512 }
  0x34   :  { %p443_p9 = scmp.ne.s32.totalorder %s566_s17, %s466_s10  ;;  %p445_p10 = scmp.lt.u32.totalorder %s566_s17, %s747_s3 }
  0x35   :  { %p446_p11 = scmp.lt.u32.totalorder %s444_s13, %s466_s10  ;;  %p448_p13 = scmp.lt.u32.totalorder %s466_s10, %s566_s17 }
  0x37   :  { %p447_p12 = por %p446_p11, %p445_p10 }
  0x39   :  { %p449_p0 = por %p448_p13, %p447_p12 }
  0x3b   :  { %p450_p1 = pnand %p449_p0, %p443_p9 }
  0x3d   :  { %453 = shalt.err (!%p450_p1)
}
  0x3e   :  { %s454_s1 = scalar_lea.vmem %s62_s21, 128  ;;  %p459_p3 = scmp.lt.s32.totalorder %s62_s21, %s62_s21 }
  0x3f   :  { %p455_p2 = scmp.ne.s32.totalorder %s62_s21, %s454_s1  ;;  %p460_p4 = scmp.lt.s32.totalorder %s454_s1, %s454_s1 }
  0x41   :  { %p461_p5 = por %p460_p4, %p459_p3 }
  0x43   :  { %p462_p6 = pnand %p461_p5, %p455_p2 }
  0x45   :  { %465 = shalt.err (!%p462_p6)
}
  0x46   :  { %64 = dma.hbm_to_vmem [thread:$0]  %s566_s17, 128, %s62_s21, [#allocation9]  }
  0x47   :  { %489 = dma.done.wait [#allocation6], 16  }
  0x48   :  { %490 = vsyncadd [#allocation6], 4294967280 }
  0x49   :  { %491 = dma.done.wait [#allocation4], 128  }
  0x4a   :  { %492 = vsyncadd [#allocation4], 4294967168 }
  0x4b   :  { %493 = dma.done.wait [#allocation9], 384  }
  0x4c   :  { %494 = vsyncadd [#allocation9], 4294966912 }
  0x4d   :  { %77 = sfence }
  0x4e   :  { %v88_v0 = vld [vmem:[#allocation7 + $0x7] sm:$0x1]  ;;  %vm89_vm0 = vcmask 122880   ;;  %v96_v1 = vld [vmem:[#allocation8] sm:$0xff]  ;;  %vm98_vm1 = vcmask 130048   ;;  %v97_v2 = vld [vmem:[#allocation8 + $0x8] sm:$0xff]  ;;  %v113_v35 = vlaneseq }
  0x4f   :  { %90 = vst.msk [vmem:[#allocation2] sm:$0x1] %vm89_vm0, %v88_v0  ;;  %v101_v3 = vld [vmem:[#allocation10] sm:$0x1]  ;;  %v503_v4 = vmov 0.0   ;;  %s504_s3 = smov 16  }
  0x50   :  { %99 = vst.msk [vmem:[#allocation2 + $0x1] sm:$0xff] %vm98_vm1, %v96_v1  ;;  %100 = vst.msk [vmem:[#allocation2 + $0x9] sm:$0xff] %vm98_vm1, %v97_v2  ;;  %vm117_vm2 = vcmask 1047680   ;;  %s505_s2 = smov 113   ;;  %s506_s16 = smov 127   ;;  %v650_v36 = vand.u32 127, %v113_v35 }
  0x51   :  { %95 = vst.msk [vmem:[#allocation2] sm:$0x1] %vm89_vm0, %v503_v4  ;;  %102 = vst.msk [vmem:[#allocation2 + $0x11] sm:$0x1] %vm89_vm0, %v101_v3  ;;  %s638_s17 = sld [smem:[#allocation3 + $0x1]]  ;;  %s640_s18 = sld [smem:[#allocation3 + $0xa]] }
  0x52   :  { %106 = vst.msk [vmem:[#allocation2 + $0x11] sm:$0x1] %vm89_vm0, %v503_v4  ;;  %s642_s19 = sld [smem:[#allocation3]]  ;;  %s644_s20 = sld [smem:[#allocation3 + $0x9]]  ;;  %vm115_vm3 = vcmp.gt.s32.totalorder %v650_v36, 0  ;;  %vm116_vm4 = vcmp.lt.s32.totalorder %v650_v36, 15 }
  0x53   :  { %s646_s21 = sld [smem:[#allocation3 + $0x4]]  ;;  %s648_s22 = sld [smem:[#allocation3 + $0xd]]  ;;  %v507_v36 = vmov 0   ;;  %vm331_vm13 = vcmask 123904  }
  0x54   :  { %s652_s23 = sld [smem:[#allocation3 + $0x3]]  ;;  %s654_s24 = sld [smem:[#allocation3 + $0xc]] }
  0x55   :  { %s656_s25 = sld [smem:[#allocation3 + $0x2]]  ;;  %s658_s26 = sld [smem:[#allocation3 + $0xb]] }
  0x56   :  { %s660_s27 = sld [smem:[#allocation3 + $0x5]]  ;;  %s667_s0 = sld [smem:[#allocation3 + $0xe]] }
  0x57   :  { %v596_v5 = vld [vmem:[#allocation2 + $0x1] sm:$0xff]  ;;  %v602_v7 = vld [vmem:[#allocation2 + $0x9] sm:$0xff]  ;;  %v155_v37 = vstv %s638_s17  ;;  %v173_v38 = vstv %s640_s18  ;;  %s669_s28 = sld [smem:[#allocation3 + $0x7]]  ;;  %s672_s29 = sld [smem:[#allocation3 + $0x10]] }
  0x58   :  { %v598_v6 = vld [vmem:[#allocation2] sm:$0xff]  ;;  %184 = vrot.lane.b32.xlu1 %v596_v5, %s504_s3  ;;  %v604_v8 = vld [vmem:[#allocation2 + $0x8] sm:$0xff]  ;;  %v149_v39 = vstv %s642_s19  ;;  %v167_v40 = vstv %s644_s20  ;;  %s685_s30 = sld [smem:[#allocation3 + $0x6]]  ;;  %s687_s5 = sld [smem:[#allocation3 + $0xf]] }
  0x59   :  { %118 = vrot.lane.b32.xlu0 %v598_v6, %s504_s3  ;;  %v608_v9 = vld [vmem:[#allocation2 + $0xa] sm:$0xff]  ;;  %v610_v10 = vld [vmem:[#allocation2 + $0x2] sm:$0xff]  ;;  %v157_v41 = vmul.f32 %v155_v37, %v604_v8  ;;  %v175_v44 = vmul.f32 %v173_v38, %v604_v8  ;;  %v221_v46 = vstv %s646_s21  ;;  %v239_v47 = vstv %s648_s22  ;;  %s701_s6 = sld [smem:[#allocation3 + $0x8]]  ;;  %s712_s7 = sld [smem:[#allocation3 + $0x11]] }
  0x5a   :  { %v215_v50 = vstv %s652_s23  ;;  %v233_v51 = vstv %s654_s24  ;;  %v156_v54 = vmul.f32 %v155_v37, %v598_v6  ;;  %v174_v57 = vmul.f32 %v173_v38, %v598_v6  ;;  %s508_s8 = smov [#allocation11]  }
  0x5b   :  { %v161_v52 = vstv %s656_s25  ;;  %v179_v53 = vstv %s658_s26  ;;  %v223_v58 = vmul.f32 %v221_v46, %v602_v7  ;;  %v241_v60 = vmul.f32 %v239_v47, %v602_v7  ;;  %s339_s9 = sshll.u32 %s508_s8, 4  ;;  %s340_s9 = int_to_ptr.vmem [resolvable:$true] %s339_s9 }
  0x5c   :  { %187 = vrot.lane.b32.xlu1 %v602_v7, %s504_s3  ;;  %v227_v59 = vstv %s660_s27  ;;  %s467_s10 = scalar_lea.vmem %s340_s9, 64  ;;  %p472_p8 = scmp.lt.s32.totalorder %s340_s9, %s340_s9 }
  0x5d   :  { %121 = vrot.lane.b32.xlu0 %v604_v8, %s504_s3  ;;  %p468_p7 = scmp.ne.s32.totalorder %s340_s9, %s467_s10  ;;  %p473_p9 = scmp.lt.s32.totalorder %s467_s10, %s467_s10 }
  0x5f   :  { %p474_p10 = por %p473_p9, %p472_p8 }
  0x60   :  { %253 = vrot.lane.b32.xlu1 %v608_v9, %s504_s3 }
  0x61   :  { %250 = vrot.lane.b32.xlu0 %v610_v10, %s504_s3  ;;  %p475_p11 = pnand %p474_p10, %p468_p7 }
  0xca   :  { %v185_v12 = vpop.permute.xlu1 %184 }
  0xcb   :  { %v119_v11 = vpop.permute.xlu0 %118  ;;  %v186_v14 = vsel %vm117_vm2, %v185_v12, %v596_v5  ;;  %v287_v12 = vstv %s669_s28 }
  0xcc   :  { %v120_v13 = vsel %vm117_vm2, %v119_v11, %v598_v6  ;;  %v240_v11 = vmul.f32 %v239_v47, %v596_v5  ;;  %v289_v38 = vmul.f32 %v287_v12, %v608_v9  ;;  %v288_v47 = vmul.f32 %v287_v12, %v610_v10 }
  0xcd   :  { %124 = vrot.lane.b32.xlu0 %v120_v13, %s504_s3 }
  0xce   :  { %v188_v16 = vpop.permute.xlu1 %187 }
  0xcf   :  { %v122_v15 = vpop.permute.xlu0 %121  ;;  %v189_v18 = vsel %vm117_vm2, %v188_v16, %v602_v7 }
  0xd0   :  { %v123_v17 = vsel %vm117_vm2, %v122_v15, %v604_v8 }
  0xd1   :  { %190 = vrot.lane.b32.xlu0 %v186_v14, %s504_s3  ;;  %126 = vrot.lane.b32.xlu1 %v123_v17, %s504_s3  ;;  %v305_v17 = vstv %s672_s29 }
  0xd2   :  { %v254_v19 = vpop.permute.xlu1 %253 }
  0xd3   :  { %v251_v20 = vpop.permute.xlu0 %250  ;;  %v255_v22 = vsel %vm117_vm2, %v254_v19, %v608_v9 }
  0xd4   :  { %v252_v21 = vsel %vm117_vm2, %v251_v20, %v610_v10 }
  0xd5   :  { %192 = vrot.lane.b32.xlu1 %v189_v18, %s504_s3  ;;  %256 = vrot.lane.b32.xlu0 %v252_v21, %s504_s3 }
  0xd9   :  { %258 = vrot.lane.b32.xlu1 %v255_v22, %s504_s3 }
 0x13f   :  { %v125_v23 = vpop.permute.xlu0 %124 }
 0x140   :  { %v128_v29 = vsel %vm117_vm2, %v125_v23, %v598_v6  ;;  %v222_v6 = vmul.f32 %v221_v46, %v596_v5  ;;  %v293_v46 = vstv %s701_s6 }
 0x143   :  { %v127_v24 = vpop.permute.xlu1 %126  ;;  %v191_v25 = vpop.permute.xlu0 %190 }
 0x144   :  { %v129_v26 = vsel %vm117_vm2, %v127_v24, %v604_v8  ;;  %v194_v27 = vsel %vm117_vm2, %v191_v25, %v596_v5  ;;  %v245_v8 = vstv %s667_s0 }
 0x145   :  { %134 = vrot.lane.b32.xlu1 %v129_v26, %s505_s2  ;;  %198 = vrot.lane.b32.xlu0 %v194_v27, %s505_s2 }
 0x147   :  { %v193_v28 = vpop.permute.xlu1 %192  ;;  %v257_v32 = vpop.permute.xlu0 %256 }
 0x148   :  { %v195_v30 = vsel %vm117_vm2, %v193_v28, %v602_v7  ;;  %v260_v34 = vsel %vm117_vm2, %v257_v32, %v610_v10  ;;  %v299_v28 = vstv %s687_s5 }
 0x149   :  { %142 = vrot.lane.b32.xlu1 %v129_v26, %s506_s16  ;;  %132 = vrot.lane.b32.xlu0 %v128_v29, %s505_s2 }
 0x14b   :  { %v259_v31 = vpop.permute.xlu1 %258 }
 0x14c   :  { %v261_v33 = vsel %vm117_vm2, %v259_v31, %v608_v9 }
 0x14d   :  { %200 = vrot.lane.b32.xlu1 %v195_v30, %s505_s2  ;;  %140 = vrot.lane.b32.xlu0 %v128_v29, %s506_s16 }
 0x151   :  { %208 = vrot.lane.b32.xlu1 %v195_v30, %s506_s16  ;;  %206 = vrot.lane.b32.xlu0 %v194_v27, %s506_s16  ;;  %v281_v27 = vstv %s685_s30 }
 0x155   :  { %266 = vrot.lane.b32.xlu1 %v261_v33, %s505_s2  ;;  %264 = vrot.lane.b32.xlu0 %v260_v34, %s505_s2 }
 0x159   :  { %274 = vrot.lane.b32.xlu1 %v261_v33, %s506_s16  ;;  %272 = vrot.lane.b32.xlu0 %v260_v34, %s506_s16 }
 0x1b7   :  { %v135_v42 = vpop.permute.xlu1 %134  ;;  %v199_v43 = vpop.permute.xlu0 %198 }
 0x1b8   :  { %v139_v45 = vsel %vm115_vm3, %v135_v42, 0.0  ;;  %v204_v7 = vsel %vm115_vm3, %v199_v43, 0.0 }
 0x1b9   :  { %v151_v48 = vmul.f32 %v149_v39, %v139_v45  ;;  %v169_v49 = vmul.f32 %v167_v40, %v139_v45  ;;  %v216_v25 = vmul.f32 %v215_v50, %v204_v7  ;;  %v234_v26 = vmul.f32 %v233_v51, %v204_v7 }
 0x1bb   :  { %v143_v55 = vpop.permute.xlu1 %142  ;;  %v133_v56 = vpop.permute.xlu0 %132  ;;  %v159_v61 = vadd.f32 %v157_v41, %v151_v48  ;;  %v177_v62 = vadd.f32 %v175_v44, %v169_v49 }
 0x1bc   :  { %v147_v63 = vsel %vm116_vm4, %v143_v55, 0.0  ;;  %v138_v0 = vsel %vm115_vm3, %v133_v56, 0.0 }
 0x1bd   :  { %v163_v1 = vmul.f32 %v161_v52, %v147_v63  ;;  %v181_v2 = vmul.f32 %v179_v53, %v147_v63  ;;  %v150_v3 = vmul.f32 %v149_v39, %v138_v0  ;;  %v168_v4 = vmul.f32 %v167_v40, %v138_v0 }
 0x1be   :  { %v307_v39 = vmul.f32 %v305_v17, %v608_v9  ;;  %v311_v0 = vstv %s712_s7 }
 0x1bf   :  { %v165_v13 = vadd.f32 %v163_v1, %v159_v61  ;;  %v183_v14 = vadd.f32 %v181_v2, %v177_v62  ;;  %v201_v15 = vpop.permute.xlu1 %200  ;;  %v141_v16 = vpop.permute.xlu0 %140  ;;  %v158_v18 = vadd.f32 %v156_v54, %v150_v3  ;;  %v176_v19 = vadd.f32 %v174_v57, %v168_v4 }
 0x1c0   :  { %v205_v20 = vsel %vm115_vm3, %v201_v15, 0.0  ;;  %v146_v5 = vsel %vm116_vm4, %v141_v16, 0.0 }
 0x1c1   :  { %v217_v21 = vmul.f32 %v215_v50, %v205_v20  ;;  %v235_v22 = vmul.f32 %v233_v51, %v205_v20  ;;  %v162_v23 = vmul.f32 %v161_v52, %v146_v5  ;;  %v180_v24 = vmul.f32 %v179_v53, %v146_v5 }
 0x1c3   :  { %v219_v29 = vadd.f32 %v217_v21, %v165_v13  ;;  %v237_v30 = vadd.f32 %v235_v22, %v183_v14  ;;  %v164_v31 = vadd.f32 %v162_v23, %v158_v18  ;;  %v182_v32 = vadd.f32 %v180_v24, %v176_v19  ;;  %v209_v33 = vpop.permute.xlu1 %208  ;;  %v207_v34 = vpop.permute.xlu0 %206 }
 0x1c4   :  { %v213_v35 = vsel %vm116_vm4, %v209_v33, 0.0  ;;  %v212_v37 = vsel %vm116_vm4, %v207_v34, 0.0 }
 0x1c5   :  { %v218_v40 = vadd.f32 %v216_v25, %v164_v31  ;;  %v236_v41 = vadd.f32 %v234_v26, %v182_v32  ;;  %v225_v42 = vadd.f32 %v223_v58, %v219_v29  ;;  %v243_v43 = vadd.f32 %v241_v60, %v237_v30 }
 0x1c6   :  { %v229_v44 = vmul.f32 %v227_v59, %v213_v35  ;;  %v247_v45 = vmul.f32 %v245_v8, %v213_v35  ;;  %v228_v49 = vmul.f32 %v227_v59, %v212_v37  ;;  %v246_v51 = vmul.f32 %v245_v8, %v212_v37 }
 0x1c7   :  { %v224_v48 = vadd.f32 %v222_v6, %v218_v40  ;;  %v242_v50 = vadd.f32 %v240_v11, %v236_v41  ;;  %v267_v52 = vpop.permute.xlu1 %266  ;;  %v265_v53 = vpop.permute.xlu0 %264  ;;  %v306_v59 = vmul.f32 %v305_v17, %v610_v10 }
 0x1c8   :  { %v231_v54 = vadd.f32 %v229_v44, %v225_v42  ;;  %v249_v55 = vadd.f32 %v247_v45, %v243_v43  ;;  %v271_v9 = vsel %vm115_vm3, %v267_v52, 0.0  ;;  %v270_v56 = vsel %vm115_vm3, %v265_v53, 0.0 }
 0x1c9   :  { %v230_v57 = vadd.f32 %v228_v49, %v224_v48  ;;  %v248_v58 = vadd.f32 %v246_v51, %v242_v50  ;;  %v283_v60 = vmul.f32 %v281_v27, %v271_v9  ;;  %v301_v61 = vmul.f32 %v299_v28, %v271_v9 }
 0x1ca   :  { %v282_v62 = vmul.f32 %v281_v27, %v270_v56  ;;  %v300_v63 = vmul.f32 %v299_v28, %v270_v56 }
 0x1cb   :  { %v285_v1 = vadd.f32 %v283_v60, %v231_v54  ;;  %v303_v2 = vadd.f32 %v301_v61, %v249_v55  ;;  %v275_v3 = vpop.permute.xlu1 %274  ;;  %v273_v4 = vpop.permute.xlu0 %272 }
 0x1cc   :  { %v284_v8 = vadd.f32 %v282_v62, %v230_v57  ;;  %v302_v6 = vadd.f32 %v300_v63, %v248_v58  ;;  %v279_v11 = vsel %vm116_vm4, %v275_v3, 0.0  ;;  %v278_v12 = vsel %vm116_vm4, %v273_v4, 0.0 }
 0x1cd   :  { %v291_v7 = vadd.f32 %v289_v38, %v285_v1  ;;  %v309_v13 = vadd.f32 %v307_v39, %v303_v2  ;;  %v295_v14 = vmul.f32 %v293_v46, %v279_v11  ;;  %v313_v15 = vmul.f32 %v311_v0, %v279_v11 }
 0x1ce   :  { %v290_v16 = vadd.f32 %v288_v47, %v284_v8  ;;  %v294_v18 = vmul.f32 %v293_v46, %v278_v12  ;;  %v308_v19 = vadd.f32 %v306_v59, %v302_v6  ;;  %v312_v10 = vmul.f32 %v311_v0, %v278_v12 }
 0x1cf   :  { %v297_v17 = vadd.f32 %v295_v14, %v291_v7  ;;  %v315_v20 = vadd.f32 %v313_v15, %v309_v13 }
 0x1d0   :  { %v296_v5 = vadd.f32 %v294_v18, %v290_v16  ;;  %v314_v21 = vadd.f32 %v312_v10, %v308_v19 }
 0x1d1   :  { %vm317_vm5 = vcmp.gt.f32.partialorder %v297_v17, 0.0  ;;  %vm319_vm6 = vcmp.gt.f32.partialorder %v315_v20, 0.0 }
 0x1d2   :  { %vm321_vm7 = vmor %vm317_vm5, %vm319_vm6  ;;  %vm316_vm8 = vcmp.gt.f32.partialorder %v296_v5, 0.0  ;;  %vm318_vm9 = vcmp.gt.f32.partialorder %v314_v21, 0.0 }
 0x1d3   :  { %vm320_vm10 = vmor %vm316_vm8, %vm318_vm9 }
 0x1d4   :  { %vm322_vm11 = vmpackc.low %vm321_vm7, %vm320_vm10 }
 0x1d5   :  { %vm323_vm12 = vmpackc.even %vm322_vm11, %vm322_vm11 }
 0x1d6   :  { %v324_v22 = vsel %vm323_vm12, 16843009, %v507_v36 }
 0x1d7   :  { %v325_v23 = vunpack.c.0.s8 %v324_v22  ;;  %v326_v24 = vunpack.c.1.s8 %v324_v22 }
 0x1d9   :  { %v327_v25 = vpack.c.b16 %v325_v23, %v325_v23  ;;  %v329_v26 = vpack.c.b16 %v326_v24, %v326_v24 }
 0x1db   :  { %v328_v27 = vpack.c.b8 %v327_v25, %v327_v25  ;;  %v330_v28 = vpack.c.b8 %v329_v26, %v329_v26 }
 0x1dd   :  { %332 = vst.msk [vmem:[#allocation11] sm:$0x3] %vm331_vm13, %v328_v27  ;;  %333 = vst.msk [vmem:[#allocation11 + $0x2] sm:$0x3] %vm331_vm13, %v330_v28 }
 0x1de   :  { %478 = shalt.err (!%p475_p11)
}
 0x1df   :  { %s479_s13 = scalar_lea.hbm %s748_s4, 64 }
 0x1e0   :  { %p480_p12 = scmp.ne.s32.totalorder %s748_s4, %s479_s13  ;;  %p483_p13 = scmp.lt.u32.totalorder %s479_s13, %s748_s4 }
 0x1e2   :  { %p485_p0 = pnand %p483_p13, %p480_p12 }
 0x1e4   :  { %488 = shalt.err (!%p485_p0)
}
 0x1e5   :  { %s509_s2 = smov 32   ;;  %s510_s16 = smov 2  }
 0x1e6   :  { %345 = dma.vmem_to_hbm [thread:$0]  %s340_s9, 64, %s748_s4, [#allocation5], %s509_s2, %s509_s2, %s510_s16  }
 0x1e7   :  { %495 = dma.done.wait [#allocation5], 64  }
 0x1e8   :  { %496 = vsyncadd [#allocation5], 4294967232 }
 0x1e9   :  { %349 = vsyncpa [#allocation4], 1 }
 0x1ea   :  { %350 = vsyncpa [#allocation9], 1 }
 0x1eb   :  { %351 = vsyncpa [#allocation5], 1 }
 0x1ec   :  { %352 = vsyncpa [#allocation6], 1 }

</bundles_post_ra>
